<compile_context>
chip_gen: v5e
topology: v5e:2x2
jax: 0.10.0
libtpu: 0.0.40
codegen_flags: <defaults>
</compile_context>

<pallas_src>
import functools

import jax
import jax.numpy as jnp
from jax.experimental import pallas as pl
from jax.experimental.pallas import tpu as pltpu


# =============================================================================
# Kernel: per-step (G graphs) GCN x2 + attention scores + unnormalized h @ Wo
# =============================================================================
def gnn_encode_kernel(
    a_ref,      # (G, n, n)   bf16  per-graph GCN-normalized adjacency (w/ self loops)
    x_ref,      # (G, n, Fin) bf16  node features
    emb_ref,    # (G, 1, E)   bf16  per-graph app embedding
    w1_ref, b1_ref,            # GCNConv1: (Fin, H) bf16, (1, H) f32
    w2_ref, b2_ref,            # GCNConv2: (H, H)   bf16, (1, H) f32
    wah_ref, wae_ref, ba_ref,  # attention_fc split: (H, A) bf16, (E, A) bf16, (1, A) f32
    wsr_ref, bs_ref,           # attention_score: ws^T (1, A) f32, bs (1, 1) f32
    wo_ref,                    # output_fc weight: (H, O) bf16
    s_ref,      # (1, G*n, 1) f32  out: raw attention scores
    p_ref,      # (1, G*n, O) f32  out: h @ Wo (softmax scaling + bias in epilogue)
    *, graphs_per_step, nodes_per_graph,
):
    f32, bf16 = jnp.float32, jnp.bfloat16
    G, n = graphs_per_step, nodes_per_graph
    fin = x_ref.shape[-1]
    hid = w1_ref.shape[-1]
    att = wah_ref.shape[-1]
    emb_d = emb_ref.shape[-1]

    def aggregate(a, h):
        # a: (G, n, n) bf16, h: (G, n, H) bf16 -> (G, n, H) f32  (MXU, f32 acc)
        if G == 1:
            return jnp.dot(a[0], h[0], preferred_element_type=f32)[None]
        return jnp.einsum("gij,gjh->gih", a, h, preferred_element_type=f32)

    a = a_ref[...]                                      # (G, n, n) bf16
    x2 = x_ref[...].reshape(G * n, fin)                 # (G*n, Fin) bf16

    # conv1: relu( A @ (X @ W1) + b1 )
    xw = jnp.dot(x2, w1_ref[...], preferred_element_type=f32)          # (G*n, H)
    h = aggregate(a, xw.astype(bf16).reshape(G, n, hid))
    h = jnp.maximum(h + b1_ref[...], 0.0)                               # (G, n, H) f32

    # conv2: relu( A @ (H @ W2) + b2 )
    hw = jnp.dot(h.reshape(G * n, hid).astype(bf16), w2_ref[...],
                 preferred_element_type=f32)
    h = aggregate(a, hw.astype(bf16).reshape(G, n, hid))
    h = jnp.maximum(h + b2_ref[...], 0.0)                               # (G, n, H) f32

    hb = h.reshape(G * n, hid).astype(bf16)                             # (G*n, H)

    # attention_fc(concat([h, emb])) == h @ W_h + (emb @ W_e + b_a)  per graph
    e_att = jnp.dot(emb_ref[...].reshape(G, emb_d), wae_ref[...],
                    preferred_element_type=f32) + ba_ref[...]           # (G, A)
    ah = jnp.dot(hb, wah_ref[...], preferred_element_type=f32)          # (G*n, A)
    ah = ah.reshape(G, n, att) + e_att[:, None, :]
    ah = jnp.where(ah > 0.0, ah, 0.2 * ah)              # leaky_relu(slope=0.2)
    ah = ah.reshape(G * n, att)

    # attention_score: ah @ ws + bs via VPU multiply + lane reduction (tiny; no MXU)
    s = jnp.sum(ah * wsr_ref[...], axis=-1, keepdims=True) + bs_ref[...]
    s_ref[0] = s                                                        # (G*n, 1)

    # (softmax(s) * h) @ Wo == softmax(s) * (h @ Wo): project now, scale in epilogue.
    p_ref[0] = jnp.dot(hb, wo_ref[...], preferred_element_type=f32)     # (G*n, O)


# =============================================================================
# Glue: block-diagonal GCN-normalized adjacency (PyG gcn_norm semantics).
# =============================================================================
def build_block_adjacency(edge_index, edge_weight, batch_size, num_nodes):
    n_total = batch_size * num_nodes
    src = edge_index[0]
    dst = edge_index[1]
    loop = jnp.arange(n_total, dtype=src.dtype)
    src = jnp.concatenate([src, loop])
    dst = jnp.concatenate([dst, loop])
    ew = jnp.concatenate([edge_weight.astype(jnp.float32),
                          jnp.ones((n_total,), jnp.float32)])

    deg = jnp.zeros((n_total,), jnp.float32).at[dst].add(ew)
    dinv = jnp.where(deg > 0.0, jax.lax.rsqrt(deg), 0.0)
    norm = dinv[src] * ew * dinv[dst]

    # out_i = sum_{edges j->i} norm * x_j  =>  A[g, i_local, j_local] += norm
    g = dst // num_nodes
    i_loc = dst % num_nodes
    j_loc = src % num_nodes
    a = jnp.zeros((batch_size, num_nodes, num_nodes), jnp.float32)
    a = a.at[g, i_loc, j_loc].add(norm)
    return a.astype(jnp.bfloat16)      # bf16 A: half the HBM bytes, 2x MXU rate


# =============================================================================
# Per-generation tiling decisions
# =============================================================================
def _pick_vmem_limit_bytes():
    try:
        kind = jax.devices()[0].device_kind.lower()
    except Exception:
        kind = ""
    if "v2" in kind or "v3" in kind:
        return 12 * 1024 * 1024        # tiny VMEM generations
    if "v5" in kind or "v6" in kind:
        return 96 * 1024 * 1024        # 128 MiB physical VMEM
    return 48 * 1024 * 1024            # v7x (64 MiB physical) and unknown: conservative


def _choose_graphs_per_step(batch_size, n, fin, emb_dim, out_dim, vmem_limit_bytes):
    """Largest divisor G of batch_size whose double-buffered per-step streams fit
    a fraction of the VMEM budget, while keeping grid length >= 2 so the
    'parallel' batch axis can shard across TensorCores (v7x megacore)."""
    per_graph_bytes = (n * n * 2             # A   (bf16)
                       + n * fin * 2         # X   (bf16)
                       + emb_dim * 2         # emb (bf16)
                       + n * 4               # scores out (f32)
                       + n * out_dim * 4)    # p out (f32)
    stream_budget = vmem_limit_bytes // 3    # headroom for weights + Mosaic scratch
    best = 1
    for g in range(1, batch_size + 1):
        if batch_size % g:
            continue
        if batch_size >= 2 and batch_size // g < 2:
            continue                         # never collapse the grid to 1 step
        if 2 * g * per_graph_bytes > stream_budget:
            continue                         # double-buffered streams must fit
        if g * n > 4096:
            continue                         # MXU M dim saturated long before this
        best = g
    return best


# =============================================================================
# Wrapper
# =============================================================================
@functools.partial(jax.jit, static_argnames=("num_nodes",))
def gnn_attention_forward(x, edge_index, edge_weight, batch, app_embedding,
                          params, *, num_nodes):
    # Node ordering is assumed canonical (graph-major, num_nodes per graph),
    # exactly as implied by .view(batch_size, num_nodes, -1) in the reference,
    # so `batch` == repeat(arange(B), num_nodes).
    del batch
    batch_size, emb_dim = app_embedding.shape
    n = num_nodes
    fin = x.shape[1]
    hid = params["w1"].shape[1]
    att = params["wah"].shape[1]
    out_dim = params["wo"].shape[1]

    vmem_limit = _pick_vmem_limit_bytes()
    g_per_step = _choose_graphs_per_step(batch_size, n, fin, emb_dim, out_dim, vmem_limit)
    num_steps = batch_size // g_per_step
    gn = g_per_step * n

    a_blocks = build_block_adjacency(edge_index, edge_weight, batch_size, n)
    x3 = x.reshape(batch_size, n, fin).astype(jnp.bfloat16)
    emb3 = app_embedding.reshape(batch_size, 1, emb_dim).astype(jnp.bfloat16)

    bf = lambda w: w.astype(jnp.bfloat16)
    ws_row = params["ws"].T                 # (1, A) f32, consumed on the VPU

    kernel = functools.partial(gnn_encode_kernel,
                               graphs_per_step=g_per_step, nodes_per_graph=n)

    const = lambda s: (0, 0)                # weights/biases resident across the grid

    scores, p = pl.pallas_call(
        kernel,
        out_shape=(jax.ShapeDtypeStruct((num_steps, gn, 1), jnp.float32),
                   jax.ShapeDtypeStruct((num_steps, gn, out_dim), jnp.float32)),
        grid_spec=pltpu.PrefetchScalarGridSpec(
            num_scalar_prefetch=0,
            grid=(num_steps,),
            in_specs=[
                pl.BlockSpec((g_per_step, n, n), lambda s: (s, 0, 0)),        # A
                pl.BlockSpec((g_per_step, n, fin), lambda s: (s, 0, 0)),      # X
                pl.BlockSpec((g_per_step, 1, emb_dim), lambda s: (s, 0, 0)),  # emb
                pl.BlockSpec((fin, hid), const),        # w1   bf16
                pl.BlockSpec((1, hid), const),          # b1   f32
                pl.BlockSpec((hid, hid), const),        # w2   bf16
                pl.BlockSpec((1, hid), const),          # b2   f32
                pl.BlockSpec((hid, att), const),        # wah  bf16
                pl.BlockSpec((emb_dim, att), const),    # wae  bf16
                pl.BlockSpec((1, att), const),          # ba   f32
                pl.BlockSpec((1, att), const),          # ws^T f32
                pl.BlockSpec((1, 1), const),            # bs   f32
                pl.BlockSpec((hid, out_dim), const),    # wo   bf16
            ],
            out_specs=(
                pl.BlockSpec((1, gn, 1), lambda s: (s, 0, 0)),         # scores
                pl.BlockSpec((1, gn, out_dim), lambda s: (s, 0, 0)),   # h @ Wo
            ),
        ),
        compiler_params=pltpu.CompilerParams(
            dimension_semantics=("parallel",),          # shard steps across TCs
            vmem_limit_bytes=vmem_limit),
    )(a_blocks, x3, emb3,
      bf(params["w1"]), params["b1"], bf(params["w2"]), params["b2"],
      bf(params["wah"]), bf(params["wae"]), params["ba"],
      ws_row, params["bs"], bf(params["wo"]))

    # Global softmax over ALL nodes of ALL graphs (torch.softmax(..., dim=0)) and
    # the row-scaled output-FC epilogue: tiny O(B*n*O) elementwise work, fused by XLA.
    w = jax.nn.softmax(scores.reshape(batch_size * n))
    node_out = p.reshape(batch_size * n, out_dim) * w[:, None] + params["bo"]

    # view(B, num_nodes, -1).view(B, -1): zero-copy reshape.
    return node_out.reshape(batch_size, n * out_dim)


# =============================================================================
# Deterministic parameter init (shapes from GNNAttention.__init__)
# =============================================================================
def init_params(key, input_dim, hidden_dim_gnn, embedding_dim, attention_dim, output_dim):
    ks = jax.random.split(key, 10)

    def uni(k, shape, fan_in):
        scale = 1.0 / jnp.sqrt(jnp.float32(fan_in))
        return jax.random.uniform(k, shape, jnp.float32, -scale, scale)

    att_in = hidden_dim_gnn + embedding_dim
    return {
        "w1":  uni(ks[0], (input_dim, hidden_dim_gnn), input_dim),
        "b1":  jnp.zeros((1, hidden_dim_gnn), jnp.float32),   # GCNConv bias ~ zeros
        "w2":  uni(ks[1], (hidden_dim_gnn, hidden_dim_gnn), hidden_dim_gnn),
        "b2":  jnp.zeros((1, hidden_dim_gnn), jnp.float32),
        # attention_fc weight split into [hidden part ; embedding part]
        "wah": uni(ks[2], (hidden_dim_gnn, attention_dim), att_in),
        "wae": uni(ks[3], (embedding_dim, attention_dim), att_in),
        "ba":  uni(ks[4], (1, attention_dim), att_in),
        "ws":  uni(ks[5], (attention_dim, 1), attention_dim),
        "bs":  uni(ks[6], (1, 1), attention_dim),
        "wo":  uni(ks[7], (hidden_dim_gnn, output_dim), hidden_dim_gnn),
        "bo":  uni(ks[8], (1, output_dim), hidden_dim_gnn),
    }


if __name__ == "__main__":
    batch_size   = 2
    num_nodes    = 8          # nodes per graph
    input_dim    = 4
    hidden_gnn   = 32
    embedding_d  = 16
    attention_d  = 32
    output_dim   = 8
    n_total      = batch_size * num_nodes

    key = jax.random.PRNGKey(0)
    k_x, k_emb, k_ew, k_p = jax.random.split(key, 4)

    x = jax.random.normal(k_x, (n_total, input_dim), jnp.float32)
    app_embedding = jax.random.normal(k_emb, (batch_size, embedding_d), jnp.float32)

    # deterministic graph: bidirectional ring within each graph
    srcs, dsts = [], []
    for g in range(batch_size):
        base = g * num_nodes
        for i in range(num_nodes):
            j = (i + 1) % num_nodes
            srcs += [base + i, base + j]
            dsts += [base + j, base + i]
    edge_index = jnp.array([srcs, dsts], dtype=jnp.int32)
    edge_weight = jax.random.uniform(k_ew, (edge_index.shape[1],), jnp.float32, 0.5, 1.5)

    batch_vec = jnp.repeat(jnp.arange(batch_size, dtype=jnp.int32), num_nodes)

    params = init_params(k_p, input_dim, hidden_gnn, embedding_d, attention_d, output_dim)

    out = gnn_attention_forward(x, edge_index, edge_weight, batch_vec, app_embedding,
                                params, num_nodes=num_nodes)
    jax.block_until_ready(out)
    assert out.shape == (batch_size, num_nodes * output_dim)
    assert bool(jnp.all(jnp.isfinite(out)))
    print("KERNEL_OK")
</pallas_src>

<mosaic_0001>
module attributes {stable_mosaic.version = 11 : i64} {
  func.func @gnn_encode_kernel(%arg0: i32, %arg1: memref<1x8x8xbf16, #tpu.memory_space<vmem>>, %arg2: memref<1x8x4xbf16, #tpu.memory_space<vmem>>, %arg3: memref<1x1x16xbf16, #tpu.memory_space<vmem>>, %arg4: memref<4x32xbf16, #tpu.memory_space<vmem>>, %arg5: memref<1x32xf32, #tpu.memory_space<vmem>>, %arg6: memref<32x32xbf16, #tpu.memory_space<vmem>>, %arg7: memref<1x32xf32, #tpu.memory_space<vmem>>, %arg8: memref<32x32xbf16, #tpu.memory_space<vmem>>, %arg9: memref<16x32xbf16, #tpu.memory_space<vmem>>, %arg10: memref<1x32xf32, #tpu.memory_space<vmem>>, %arg11: memref<1x32xf32, #tpu.memory_space<vmem>>, %arg12: memref<1x1xf32, #tpu.memory_space<vmem>>, %arg13: memref<32x8xbf16, #tpu.memory_space<vmem>>, %arg14: memref<1x8x1xf32, #tpu.memory_space<vmem>>, %arg15: memref<1x8x8xf32, #tpu.memory_space<vmem>>) attributes {dimension_semantics = [#tpu.dimension_semantics<parallel>], iteration_bounds = array<i64: 2>, scalar_prefetch = 0 : i64, scratch_operands = 0 : i64, tpu.core_type = #tpu.core_type<tc>, window_params = [{transform_indices = @transform_0, window_bounds = array<i64: 1, 8, 8>}, {transform_indices = @transform_1, window_bounds = array<i64: 1, 8, 4>}, {transform_indices = @transform_2, window_bounds = array<i64: 1, 1, 16>}, {pipeline_mode = #tpu.pipeline_mode<synchronous>, transform_indices = @transform_3, window_bounds = array<i64: 4, 32>}, {pipeline_mode = #tpu.pipeline_mode<synchronous>, transform_indices = @transform_4, window_bounds = array<i64: 1, 32>}, {pipeline_mode = #tpu.pipeline_mode<synchronous>, transform_indices = @transform_5, window_bounds = array<i64: 32, 32>}, {pipeline_mode = #tpu.pipeline_mode<synchronous>, transform_indices = @transform_6, window_bounds = array<i64: 1, 32>}, {pipeline_mode = #tpu.pipeline_mode<synchronous>, transform_indices = @transform_7, window_bounds = array<i64: 32, 32>}, {pipeline_mode = #tpu.pipeline_mode<synchronous>, transform_indices = @transform_8, window_bounds = array<i64: 16, 32>}, {pipeline_mode = #tpu.pipeline_mode<synchronous>, transform_indices = @transform_9, window_bounds = array<i64: 1, 32>}, {pipeline_mode = #tpu.pipeline_mode<synchronous>, transform_indices = @transform_10, window_bounds = array<i64: 1, 32>}, {pipeline_mode = #tpu.pipeline_mode<synchronous>, transform_indices = @transform_11, window_bounds = array<i64: 1, 1>}, {pipeline_mode = #tpu.pipeline_mode<synchronous>, transform_indices = @transform_12, window_bounds = array<i64: 32, 8>}, {transform_indices = @transform_13, window_bounds = array<i64: 1, 8, 1>}, {transform_indices = @transform_14, window_bounds = array<i64: 1, 8, 8>}]} {
    %c0 = arith.constant 0 : index
    %c0_0 = arith.constant 0 : index
    %c0_1 = arith.constant 0 : index
    %0 = vector.load %arg1[%c0, %c0_0, %c0_1] : memref<1x8x8xbf16, #tpu.memory_space<vmem>>, vector<1x8x8xbf16>
    %c0_2 = arith.constant 0 : index
    %c0_3 = arith.constant 0 : index
    %c0_4 = arith.constant 0 : index
    %1 = vector.load %arg2[%c0_2, %c0_3, %c0_4] : memref<1x8x4xbf16, #tpu.memory_space<vmem>>, vector<1x8x4xbf16>
    %2 = vector.shape_cast %1 : vector<1x8x4xbf16> to vector<8x4xbf16>
    %c0_5 = arith.constant 0 : index
    %c0_6 = arith.constant 0 : index
    %3 = vector.load %arg4[%c0_5, %c0_6] : memref<4x32xbf16, #tpu.memory_space<vmem>>, vector<4x32xbf16>
    %cst = arith.constant dense<0.000000e+00> : vector<8x32xf32>
    %4 = tpu.matmul %2, %3, %cst {dimension_numbers = #tpu.dot_dimension_numbers<[1], [0], [0], [1], [0, 0, 1, 1], [], []>} : vector<8x4xbf16>, vector<4x32xbf16>, vector<8x32xf32> -> vector<8x32xf32>
    %5 = arith.truncf %4 : vector<8x32xf32> to vector<8x32xbf16>
    %6 = vector.shape_cast %5 : vector<8x32xbf16> to vector<1x8x32xbf16>
    %7 = vector.shape_cast %0 : vector<1x8x8xbf16> to vector<8x8xbf16>
    %8 = vector.shape_cast %6 : vector<1x8x32xbf16> to vector<8x32xbf16>
    %cst_7 = arith.constant dense<0.000000e+00> : vector<8x32xf32>
    %9 = tpu.matmul %7, %8, %cst_7 {dimension_numbers = #tpu.dot_dimension_numbers<[1], [0], [0], [1], [0, 0, 1, 1], [], []>} : vector<8x8xbf16>, vector<8x32xbf16>, vector<8x32xf32> -> vector<8x32xf32>
    %10 = vector.shape_cast %9 : vector<8x32xf32> to vector<1x8x32xf32>
    %c0_8 = arith.constant 0 : index
    %c0_9 = arith.constant 0 : index
    %11 = vector.load %arg5[%c0_8, %c0_9] : memref<1x32xf32, #tpu.memory_space<vmem>>, vector<1x32xf32>
    %12 = vector.shape_cast %11 : vector<1x32xf32> to vector<1x1x32xf32>
    %13 = vector.broadcast %12 : vector<1x1x32xf32> to vector<1x8x32xf32>
    %14 = arith.addf %10, %13 : vector<1x8x32xf32>
    %cst_10 = arith.constant 0.000000e+00 : f32
    %15 = vector.broadcast %cst_10 : f32 to vector<1x8x32xf32>
    %16 = arith.maximumf %14, %15 : vector<1x8x32xf32>
    %17 = vector.shape_cast %16 : vector<1x8x32xf32> to vector<8x32xf32>
    %18 = arith.truncf %17 : vector<8x32xf32> to vector<8x32xbf16>
    %c0_11 = arith.constant 0 : index
    %c0_12 = arith.constant 0 : index
    %19 = vector.load %arg6[%c0_11, %c0_12] : memref<32x32xbf16, #tpu.memory_space<vmem>>, vector<32x32xbf16>
    %cst_13 = arith.constant dense<0.000000e+00> : vector<8x32xf32>
    %20 = tpu.matmul %18, %19, %cst_13 {dimension_numbers = #tpu.dot_dimension_numbers<[1], [0], [0], [1], [0, 0, 1, 1], [], []>} : vector<8x32xbf16>, vector<32x32xbf16>, vector<8x32xf32> -> vector<8x32xf32>
    %21 = arith.truncf %20 : vector<8x32xf32> to vector<8x32xbf16>
    %22 = vector.shape_cast %21 : vector<8x32xbf16> to vector<1x8x32xbf16>
    %23 = vector.shape_cast %0 : vector<1x8x8xbf16> to vector<8x8xbf16>
    %24 = vector.shape_cast %22 : vector<1x8x32xbf16> to vector<8x32xbf16>
    %cst_14 = arith.constant dense<0.000000e+00> : vector<8x32xf32>
    %25 = tpu.matmul %23, %24, %cst_14 {dimension_numbers = #tpu.dot_dimension_numbers<[1], [0], [0], [1], [0, 0, 1, 1], [], []>} : vector<8x8xbf16>, vector<8x32xbf16>, vector<8x32xf32> -> vector<8x32xf32>
    %26 = vector.shape_cast %25 : vector<8x32xf32> to vector<1x8x32xf32>
    %c0_15 = arith.constant 0 : index
    %c0_16 = arith.constant 0 : index
    %27 = vector.load %arg7[%c0_15, %c0_16] : memref<1x32xf32, #tpu.memory_space<vmem>>, vector<1x32xf32>
    %28 = vector.shape_cast %27 : vector<1x32xf32> to vector<1x1x32xf32>
    %29 = vector.broadcast %28 : vector<1x1x32xf32> to vector<1x8x32xf32>
    %30 = arith.addf %26, %29 : vector<1x8x32xf32>
    %cst_17 = arith.constant 0.000000e+00 : f32
    %31 = vector.broadcast %cst_17 : f32 to vector<1x8x32xf32>
    %32 = arith.maximumf %30, %31 : vector<1x8x32xf32>
    %33 = vector.shape_cast %32 : vector<1x8x32xf32> to vector<8x32xf32>
    %34 = arith.truncf %33 : vector<8x32xf32> to vector<8x32xbf16>
    %c0_18 = arith.constant 0 : index
    %c0_19 = arith.constant 0 : index
    %c0_20 = arith.constant 0 : index
    %35 = vector.load %arg3[%c0_18, %c0_19, %c0_20] : memref<1x1x16xbf16, #tpu.memory_space<vmem>>, vector<1x1x16xbf16>
    %36 = vector.shape_cast %35 : vector<1x1x16xbf16> to vector<1x16xbf16>
    %c0_21 = arith.constant 0 : index
    %c0_22 = arith.constant 0 : index
    %37 = vector.load %arg9[%c0_21, %c0_22] : memref<16x32xbf16, #tpu.memory_space<vmem>>, vector<16x32xbf16>
    %cst_23 = arith.constant dense<0.000000e+00> : vector<1x32xf32>
    %38 = tpu.matmul %36, %37, %cst_23 {dimension_numbers = #tpu.dot_dimension_numbers<[1], [0], [0], [1], [0, 0, 1, 1], [], []>} : vector<1x16xbf16>, vector<16x32xbf16>, vector<1x32xf32> -> vector<1x32xf32>
    %c0_24 = arith.constant 0 : index
    %c0_25 = arith.constant 0 : index
    %39 = vector.load %arg10[%c0_24, %c0_25] : memref<1x32xf32, #tpu.memory_space<vmem>>, vector<1x32xf32>
    %40 = arith.addf %38, %39 : vector<1x32xf32>
    %c0_26 = arith.constant 0 : index
    %c0_27 = arith.constant 0 : index
    %41 = vector.load %arg8[%c0_26, %c0_27] : memref<32x32xbf16, #tpu.memory_space<vmem>>, vector<32x32xbf16>
    %cst_28 = arith.constant dense<0.000000e+00> : vector<8x32xf32>
    %42 = tpu.matmul %34, %41, %cst_28 {dimension_numbers = #tpu.dot_dimension_numbers<[1], [0], [0], [1], [0, 0, 1, 1], [], []>} : vector<8x32xbf16>, vector<32x32xbf16>, vector<8x32xf32> -> vector<8x32xf32>
    %43 = vector.shape_cast %42 : vector<8x32xf32> to vector<1x8x32xf32>
    %44 = vector.shape_cast %40 : vector<1x32xf32> to vector<1x1x32xf32>
    %45 = vector.broadcast %44 : vector<1x1x32xf32> to vector<1x8x32xf32>
    %46 = arith.addf %43, %45 : vector<1x8x32xf32>
    %cst_29 = arith.constant 0.000000e+00 : f32
    %47 = vector.broadcast %cst_29 : f32 to vector<1x8x32xf32>
    %48 = arith.cmpf ogt, %46, %47 : vector<1x8x32xf32>
    %cst_30 = arith.constant 2.000000e-01 : f32
    %49 = vector.broadcast %cst_30 : f32 to vector<1x8x32xf32>
    %50 = arith.mulf %49, %46 : vector<1x8x32xf32>
    %51 = arith.select %48, %46, %50 : vector<1x8x32xi1>, vector<1x8x32xf32>
    %52 = vector.shape_cast %51 : vector<1x8x32xf32> to vector<8x32xf32>
    %c0_31 = arith.constant 0 : index
    %c0_32 = arith.constant 0 : index
    %53 = vector.load %arg11[%c0_31, %c0_32] : memref<1x32xf32, #tpu.memory_space<vmem>>, vector<1x32xf32>
    %54 = vector.broadcast %53 : vector<1x32xf32> to vector<8x32xf32>
    %55 = arith.mulf %52, %54 : vector<8x32xf32>
    %cst_33 = arith.constant dense<0.000000e+00> : vector<8xf32>
    %56 = vector.multi_reduction <add>, %55, %cst_33 [1] : vector<8x32xf32> to vector<8xf32>
    %57 = vector.shape_cast %56 : vector<8xf32> to vector<8x1xf32>
    %c0_34 = arith.constant 0 : index
    %c0_35 = arith.constant 0 : index
    %58 = vector.load %arg12[%c0_34, %c0_35] : memref<1x1xf32, #tpu.memory_space<vmem>>, vector<1x1xf32>
    %59 = vector.broadcast %58 : vector<1x1xf32> to vector<8x1xf32>
    %60 = arith.addf %57, %59 : vector<8x1xf32>
    %c0_36 = arith.constant 0 : index
    %c0_37 = arith.constant 0 : index
    %c0_38 = arith.constant 0 : index
    %61 = vector.load %arg14[%c0_36, %c0_37, %c0_38] : memref<1x8x1xf32, #tpu.memory_space<vmem>>, vector<1x8x1xf32>
    %62 = vector.shape_cast %61 : vector<1x8x1xf32> to vector<8x1xf32>
    %63 = vector.shape_cast %60 : vector<8x1xf32> to vector<1x8x1xf32>
    tpu.vector_store %arg14[%c0_36, %c0_37, %c0_38], %63 {strides = array<i32>} : memref<1x8x1xf32, #tpu.memory_space<vmem>>, vector<1x8x1xf32>,
    %c0_39 = arith.constant 0 : index
    %c0_40 = arith.constant 0 : index
    %64 = vector.load %arg13[%c0_39, %c0_40] : memref<32x8xbf16, #tpu.memory_space<vmem>>, vector<32x8xbf16>
    %cst_41 = arith.constant dense<0.000000e+00> : vector<8x8xf32>
    %65 = tpu.matmul %34, %64, %cst_41 {dimension_numbers = #tpu.dot_dimension_numbers<[1], [0], [0], [1], [0, 0, 1, 1], [], []>} : vector<8x32xbf16>, vector<32x8xbf16>, vector<8x8xf32> -> vector<8x8xf32>
    %c0_42 = arith.constant 0 : index
    %c0_43 = arith.constant 0 : index
    %c0_44 = arith.constant 0 : index
    %66 = vector.load %arg15[%c0_42, %c0_43, %c0_44] : memref<1x8x8xf32, #tpu.memory_space<vmem>>, vector<1x8x8xf32>
    %67 = vector.shape_cast %66 : vector<1x8x8xf32> to vector<8x8xf32>
    %68 = vector.shape_cast %65 : vector<8x8xf32> to vector<1x8x8xf32>
    tpu.vector_store %arg15[%c0_42, %c0_43, %c0_44], %68 {strides = array<i32>} : memref<1x8x8xf32, #tpu.memory_space<vmem>>, vector<1x8x8xf32>,
    return
  }
  func.func @transform_0(%arg0: i32) -> (i32, i32, i32) {
    %c0_i32 = arith.constant 0 : i32
    %c0_i32_0 = arith.constant 0 : i32
    %c0_i32_1 = arith.constant 0 : i32
    return %arg0, %c0_i32, %c0_i32_0 : i32, i32, i32
  }
  func.func @transform_1(%arg0: i32) -> (i32, i32, i32) {
    %c0_i32 = arith.constant 0 : i32
    %c0_i32_0 = arith.constant 0 : i32
    %c0_i32_1 = arith.constant 0 : i32
    return %arg0, %c0_i32, %c0_i32_0 : i32, i32, i32
  }
  func.func @transform_2(%arg0: i32) -> (i32, i32, i32) {
    %c0_i32 = arith.constant 0 : i32
    %c0_i32_0 = arith.constant 0 : i32
    %c0_i32_1 = arith.constant 0 : i32
    return %arg0, %c0_i32, %c0_i32_0 : i32, i32, i32
  }
  func.func @transform_3(%arg0: i32) -> (i32, i32) {
    %c0_i32 = arith.constant 0 : i32
    %c0_i32_0 = arith.constant 0 : i32
    %c0_i32_1 = arith.constant 0 : i32
    return %c0_i32, %c0_i32_0 : i32, i32
  }
  func.func @transform_4(%arg0: i32) -> (i32, i32) {
    %c0_i32 = arith.constant 0 : i32
    %c0_i32_0 = arith.constant 0 : i32
    %c0_i32_1 = arith.constant 0 : i32
    return %c0_i32, %c0_i32_0 : i32, i32
  }
  func.func @transform_5(%arg0: i32) -> (i32, i32) {
    %c0_i32 = arith.constant 0 : i32
    %c0_i32_0 = arith.constant 0 : i32
    %c0_i32_1 = arith.constant 0 : i32
    return %c0_i32, %c0_i32_0 : i32, i32
  }
  func.func @transform_6(%arg0: i32) -> (i32, i32) {
    %c0_i32 = arith.constant 0 : i32
    %c0_i32_0 = arith.constant 0 : i32
    %c0_i32_1 = arith.constant 0 : i32
    return %c0_i32, %c0_i32_0 : i32, i32
  }
  func.func @transform_7(%arg0: i32) -> (i32, i32) {
    %c0_i32 = arith.constant 0 : i32
    %c0_i32_0 = arith.constant 0 : i32
    %c0_i32_1 = arith.constant 0 : i32
    return %c0_i32, %c0_i32_0 : i32, i32
  }
  func.func @transform_8(%arg0: i32) -> (i32, i32) {
    %c0_i32 = arith.constant 0 : i32
    %c0_i32_0 = arith.constant 0 : i32
    %c0_i32_1 = arith.constant 0 : i32
    return %c0_i32, %c0_i32_0 : i32, i32
  }
  func.func @transform_9(%arg0: i32) -> (i32, i32) {
    %c0_i32 = arith.constant 0 : i32
    %c0_i32_0 = arith.constant 0 : i32
    %c0_i32_1 = arith.constant 0 : i32
    return %c0_i32, %c0_i32_0 : i32, i32
  }
  func.func @transform_10(%arg0: i32) -> (i32, i32) {
    %c0_i32 = arith.constant 0 : i32
    %c0_i32_0 = arith.constant 0 : i32
    %c0_i32_1 = arith.constant 0 : i32
    return %c0_i32, %c0_i32_0 : i32, i32
  }
  func.func @transform_11(%arg0: i32) -> (i32, i32) {
    %c0_i32 = arith.constant 0 : i32
    %c0_i32_0 = arith.constant 0 : i32
    %c0_i32_1 = arith.constant 0 : i32
    return %c0_i32, %c0_i32_0 : i32, i32
  }
  func.func @transform_12(%arg0: i32) -> (i32, i32) {
    %c0_i32 = arith.constant 0 : i32
    %c0_i32_0 = arith.constant 0 : i32
    %c0_i32_1 = arith.constant 0 : i32
    return %c0_i32, %c0_i32_0 : i32, i32
  }
  func.func @transform_13(%arg0: i32) -> (i32, i32, i32) {
    %c0_i32 = arith.constant 0 : i32
    %c0_i32_0 = arith.constant 0 : i32
    %c0_i32_1 = arith.constant 0 : i32
    return %arg0, %c0_i32, %c0_i32_0 : i32, i32, i32
  }
  func.func @transform_14(%arg0: i32) -> (i32, i32, i32) {
    %c0_i32 = arith.constant 0 : i32
    %c0_i32_0 = arith.constant 0 : i32
    %c0_i32_1 = arith.constant 0 : i32
    return %arg0, %c0_i32, %c0_i32_0 : i32, i32, i32
  }
}

</mosaic_0001>

<bundles_post_ra>
// kernel: gnn_attention_forward.1
= control target key start
LH: loop header
LB: loop body
LE: loop exit
PB: predicated region body
PF: predicated region fallthrough
CT: control target
= control target key end

     0   :  { %s983_s15 = smov 0   ;;  %s1059_s0 = inlined_call_operand.vmem [shape: bf16[2,8,8], index: 0, kind: input, shape index: {}]   ;;  %s1060_s1 = inlined_call_operand.vmem [shape: bf16[2,8,4], index: 1, kind: input, shape index: {}]   ;;  %s1061_s2 = inlined_call_operand.vmem [shape: bf16[2,1,16], index: 2, kind: input, shape index: {}]   ;;  %s1062_s3 = inlined_call_operand.vmem [shape: bf16[4,32], index: 3, kind: input, shape index: {}]   ;;  %s1063_s4 = inlined_call_operand.vmem [shape: f32[1,32], index: 4, kind: input, shape index: {}]   ;;  %s1064_s5 = inlined_call_operand.vmem [shape: bf16[32,32], index: 5, kind: input, shape index: {}]   ;;  %s1065_s6 = inlined_call_operand.vmem [shape: f32[1,32], index: 6, kind: input, shape index: {}]   ;;  %s1066_s7 = inlined_call_operand.vmem [shape: bf16[32,32], index: 7, kind: input, shape index: {}]   ;;  %s1067_s8 = inlined_call_operand.vmem [shape: bf16[16,32], index: 8, kind: input, shape index: {}]   ;;  %s1068_s9 = inlined_call_operand.vmem [shape: f32[1,32], index: 9, kind: input, shape index: {}]   ;;  %s1069_s10 = inlined_call_operand.vmem [shape: f32[1,32], index: 10, kind: input, shape index: {}]   ;;  %s1070_s11 = inlined_call_operand.<no memory space> [shape: f32[1,1], index: 11, kind: input, shape index: {}]   ;;  %s1071_s12 = inlined_call_operand.vmem [shape: bf16[32,8], index: 12, kind: input, shape index: {}]   ;;  %s1072_s13 = inlined_call_operand.vmem [shape: f32[2,8,1], index: 13, kind: output, shape index: {0}]   ;;  %s1073_s14 = inlined_call_operand.vmem [shape: f32[2,8,8], index: 14, kind: output, shape index: {1}]  }
   0x1   :  { %v20_v0 = vstv %s1070_s11 }
   0x2   :  { %21 = vst [vmem:[#allocation2] sm:$0x1] %v20_v0 }
   0x3 LB: > { %s832_s16 = sadd.s32 4294967295, %s903_s15   ;;  %p836_p0 = scmp.ge.s32.totalorder %s903_s15, 1  ;;  %s903_s15 = sphi %s983_s15, %s27_s15  }
   0x4   : > { %p433_p1 = scmp.lt.s32.totalorder %s903_s15, 3 }
   0x6   : > { %p434_p2 = pnand %p836_p0, %p433_p1 }
   0x7   : > { %p488_p3 = scmp.lt.s32.totalorder (!%p434_p2), %s832_s16, 1 }
   0x8   : > { %437 = sbr.rel (%p434_p2) target bundleno = 811 (0x32b), region = 72 }
   0xd   : > { %v510_v1 = vld [vmem:[%s1062_s3] sm:$0x3]  ;;  %vm515_vm0 = vcmask 1041408   ;;  %s1075_s16 = smov (!%p488_p3, %s832_s16), 1  ;;  %vm511_vm1 = vcmask 31744   ;;  %vm537_vm2 = vcmask 1043456  }
   0xe   : > { %v517_v2 = vsel %vm515_vm0, %v510_v1, 0  ;;  %s837_s11 = sshll.u32 %s1075_s16, 2  ;;  %vm533_vm3 = vcmask 64512   ;;  %v879_v9 = vld [vmem:[%s1064_s5 + $0x8] sm:$0xff]  ;;  %v878_v10 = vld [vmem:[%s1064_s5] sm:$0xff]  ;;  %vm577_vm4 = vcmask 261120  }
   0xf   : > { %526 = vmatpush.bf16.msra.mxu0 %v517_v2  ;;  %s495_s21 = scalar_lea.vmem %s1060_s1, %s837_s11  ;;  %s491_s24 = scalar_lea.vmem %s1059_s0, %s837_s11  ;;  %587 = vmatpush.bf16.msra.mxu2 %v879_v9  ;;  %v893_v11 = vld [vmem:[%s1063_s4] ss:$0 sm:$0xff]  ;;  %v882_v18 = vld [vmem:[%s1066_s7 + $0x8] sm:$0xff]  ;;  %vm628_vm5 = vcmask 130048   ;;  %vm695_vm7 = vcmask 7168  }
  0x10   : > { %v509_v3 = vld [vmem:[%s495_s21] sm:$0xf]  ;;  %s498_s11 = scalar_lea.vmem %s1061_s2, %s1075_s16  ;;  %v884_v25 = vld [vmem:[%s1071_s12 + $0x8] sm:$0xff] }
  0x11   : > { %v508_v7 = vld [vmem:[%s491_s24] sm:$0xf] }
  0x12   : > { %841 = vmatmul.msk.bf16.vlgmr.msra.gmra.mxu0 %vm511_vm1, %v509_v3  ;;  %v880_v17 = vld [vmem:[%s1067_s8] sm:$0xff] }
  0x13   : > { %588 = vmatpush.bf16.msra.mxu2 %v878_v10  ;;  %639 = vmatpush.bf16.msrb.mxu0 %v880_v17  ;;  %v618_v19 = vld [vmem:[%s498_s11] sm:$0x1]  ;;  %s839_s11 = sshll.u32 %s1075_s16, 3 }
  0x14   : > { %v881_v20 = vld [vmem:[%s1066_s7] sm:$0xff]  ;;  %s506_s23 = scalar_lea.vmem %s1073_s14, %s839_s11  ;;  %s502_s25 = scalar_lea.vmem %s1072_s13, %s839_s11 }
  0x15   : > { %v883_v26 = vld [vmem:[%s1071_s12] sm:$0xff] }
  0x16   : > { %v894_v29 = vld [vmem:[%s1065_s6] ss:$0 sm:$0xff] }
  0x17   : > { %v621_v35 = vld [vmem:[%s1068_s9] sm:$0x1] }
  0x18   : > { %v895_v40 = vld [vmem:[%s1069_s10] ss:$0 sm:$0xff] }
  0x19   : > { %v896_v48 = vld [vmem:[#allocation2] ss:$0 sm:$0xff] }
  0x22   : > { %857 = vmatmul.msk.bf16.vlgmr.msrb.gmra.mxu0 %vm628_vm5, %v618_v19 }
  0x8f   : > { %v528_v4 = vpop.f32.mrf.mxu0 }
  0x90   : > { %v532_v5 = vpack.c.bf16 %v528_v4, %v528_v4 }
  0x92   : > { %v539_v6 = vsel %vm537_vm2, %v532_v5, 0 }
  0x93   : > { %548 = vmatpush.bf16.msra.mxu1 %v539_v6 }
  0x96   : > { %842 = vmatmul.msk.bf16.vlgmr.msra.gmra.mxu1 %vm533_vm3, %v508_v7 }
  0x97   : > { %v530_v8 = vpop.f32.mrf.mxu0  ;;  %670 = vmatpush.bf16.msrb.mxu1 %v882_v18 }
  0x9b   : > { %671 = vmatpush.bf16.msrb.mxu1 %v881_v20 }
  0x9f   : > { %v641_v27 = vpop.f32.mrf.mxu0 }
  0xa0   : > { %v642_v36 = vadd.f32 %v641_v27, %v621_v35 }
  0xa2   : > { %v677_v37 = vperm.slane %v642_v36, 0 }
  0xa7   : > { %v643_v28 = vpop.f32.mrf.mxu0 }
 0x113   : > { %v550_v12 = vpop.f32.mrf.mxu1 }
 0x114   : > { %v558_v13 = vadd.f32 %v893_v11, %v550_v12 }
 0x116   : > { %v559_v14 = vmax.f32 %v558_v13, 0.0 }
 0x118   : > { %v560_v15 = vpack.c.bf16 %v559_v14, %v559_v14 }
 0x11a   : > { %851 = vmatmul.msk.bf16.vlgmr.msra.gmra.mxu2 %vm577_vm4, %v560_v15 }
 0x11b   : > { %v552_v16 = vpop.f32.mrf.mxu1 }
 0x19d   : > { %v590_v21 = vpop.f32.mrf.mxu2 }
 0x19e   : > { %v594_v22 = vpack.c.bf16 %v590_v21, %v590_v21 }
 0x1a0   : > { %v596_v23 = vsel %vm537_vm2, %v594_v22, 0 }
 0x1a1   : > { %605 = vmatpush.bf16.msra.mxu3 %v596_v23 }
 0x1a4   : > { %852 = vmatmul.msk.bf16.vlgmr.msra.gmra.mxu3 %vm533_vm3, %v508_v7 }
 0x1a5   : > { %v592_v24 = vpop.f32.mrf.mxu2  ;;  %719 = vmatpush.bf16.msrb.mxu3 %v884_v25 }
 0x1a9   : > { %720 = vmatpush.bf16.msrb.mxu3 %v883_v26 }
 0x227   : > { %v607_v30 = vpop.f32.mrf.mxu3 }
 0x228   : > { %v615_v31 = vadd.f32 %v894_v29, %v607_v30 }
 0x22a   : > { %v616_v32 = vmax.f32 %v615_v31, 0.0 }
 0x22c   : > { %v617_v33 = vpack.c.bf16 %v616_v32, %v616_v32 }
 0x22e   : > { %866 = vmatmul.msk.bf16.vlgmr.msrb.gmra.mxu1 %vm577_vm4, %v617_v33  ;;  %875 = vmatmul.msk.bf16.vlgmr.msrb.gmra.mxu3 %vm577_vm4, %v617_v33 }
 0x22f   : > { %v609_v34 = vpop.f32.mrf.mxu3 }
 0x2ab   : > { %v673_v38 = vpop.f32.mrf.mxu1 }
 0x2ac   : > { %v678_v39 = vadd.f32 %v677_v37, %v673_v38 }
 0x2ae   : > { %v680_v41 = vmul.f32 0.2, %v678_v39  ;;  %vm679_vm6 = vcmp.gt.f32.partialorder %v678_v39, 0.0 }
 0x2b0   : > { %v681_v42 = vsel %vm679_vm6, %v678_v39, %v680_v41 }
 0x2b1   : > { %v722_v43 = vpop.f32.mrf.mxu3  ;;  %v686_v44 = vmul.f32 %v895_v40, %v681_v42 }
 0x2b2   : > { %726 = vst.msk [vmem:[%s506_s23] sm:$0xff] %vm533_vm3, %v722_v43 }
 0x2b3   : > { %v675_v45 = vpop.f32.mrf.mxu1  ;;  %v687_v46 = vsel %vm577_vm4, %v686_v44, 0.0 }
 0x2b4   : > { %688 = vadd.xlane.f32.xlu0 %v687_v46 }
 0x2b9   : > { %v724_v47 = vpop.f32.mrf.mxu3 }
 0x327   : > { %v689_v49 = vpop.xlane.xlu0 %688 }
 0x328   : > { %v694_v50 = vadd.f32 %v896_v48, %v689_v49 }
 0x32a   : > { %696 = vst.msk [vmem:[%s502_s25] sm:$0xff] %vm695_vm7, %v694_v50 }
 0x32b PF: > { %s27_s15 = sadd.s32 1, %s903_s15  }
 0x32c   : > { %p24_p4 = scmp.ge.s32.totalorder %s27_s15, 4  }
 0x32e   :  { %26 = sbr.rel (!%p24_p4) target bundleno = 3 (0x3), region = 120 }

</bundles_post_ra>
